<compile_context>
chip_gen: v5e
topology: v5e:2x2
jax: 0.10.0
libtpu: 0.0.40
codegen_flags: <defaults>
</compile_context>

<pallas_src>
import functools

import jax
import jax.numpy as jnp
from jax import lax
from jax.experimental import pallas as pl
from jax.experimental.pallas import tpu as pltpu

NEG_SLOPE = 0.01   # torch F.leaky_relu default negative_slope
BN_EPS = 1e-5      # torch BatchNorm2d default eps


# ----- padding helpers copied from the torch model (evaluated at (64,128,3,2)) -----
def calc_inv_padding(h, w, k, s):
    return ((k - h + (h - 1) * s) // 2, (k - w + (w - 1) * s) // 2)


def calc_padding(h, w, k, s):
    return (((h - 1) * s + k - h) // 2, ((w - 1) * s + k - w) // 2)


ENC_PAD = calc_padding(64, 128, 3, 2)       # (32, 64)
DEC_PAD = calc_inv_padding(64, 128, 3, 2)   # (32, 64)

BK_MAX = 2304                                # one K block covers every 3x3x256 conv
BM_CANDS = (512, 448, 384, 320, 256)         # M tile candidates (pick min padding)


def _round_up(x, m):
    return (x + m - 1) // m * m


def _apply_act(x, act):
    if act is None:
        return x
    if act == "leaky":
        return jnp.where(x > 0, x, NEG_SLOPE * x)
    if act == "tanh":
        return jnp.tanh(x)
    if act == "sigmoid":
        return jax.nn.sigmoid(x)
    raise ValueError(act)


# ======================= Pallas GEMM kernel (conv hot path) =======================

@functools.lru_cache(maxsize=None)
def _make_matmul_kernel(act, has_res, multi_k, with_stats):
    def kernel(*refs):
        a_ref, b_ref, bias_ref = refs[0], refs[1], refs[2]
        idx = 3
        res_ref = None
        if has_res:
            res_ref = refs[idx]
            idx += 1
        o_ref = refs[idx]
        idx += 1
        sum_ref = sq_ref = None
        if with_stats:
            sum_ref, sq_ref = refs[idx], refs[idx + 1]
            idx += 2
        acc_ref = refs[idx] if multi_k else None

        def epilogue(acc):
            # f32 epilogue on the accumulator (v5e has no bf16 VPU paths); cast only at store.
            r = acc + bias_ref[...]
            if has_res:
                r = r + res_ref[...].astype(jnp.float32)
            if with_stats:
                bn_ = r.shape[-1]
                cs = jnp.sum(r, axis=0)
                cq = jnp.sum(r * r, axis=0)
                sum_ref[...] = jnp.broadcast_to(cs, (1, 8, bn_))
                sq_ref[...] = jnp.broadcast_to(cq, (1, 8, bn_))
            o_ref[...] = _apply_act(r, act).astype(o_ref.dtype)

        if multi_k:
            @pl.when(pl.program_id(2) == 0)
            def _():
                acc_ref[...] = jnp.zeros_like(acc_ref)

            acc_ref[...] += jnp.dot(a_ref[...], b_ref[...],
                                    preferred_element_type=jnp.float32)

            @pl.when(pl.program_id(2) == pl.num_programs(2) - 1)
            def _():
                epilogue(acc_ref[...])
        else:
            # Common case (K fits one block): no accumulator round-trip, direct store.
            epilogue(jnp.dot(a_ref[...], b_ref[...],
                             preferred_element_type=jnp.float32))

    return kernel


@functools.lru_cache(maxsize=None)
def _matmul_call(Mp, Kp, Np, bm, bn, bk, act, has_res, with_stats):
    multi_k = Kp > bk
    mb, nb, nk = Mp // bm, Np // bn, Kp // bk

    if multi_k:
        grid = (mb, nb, nk)
        a_spec = pl.BlockSpec((bm, bk), lambda i, j, k: (i, k))
        b_spec = pl.BlockSpec((bk, bn), lambda i, j, k: (k, j))
        v_spec = pl.BlockSpec((1, bn), lambda i, j, k: (0, j))
        o_spec = pl.BlockSpec((bm, bn), lambda i, j, k: (i, j))
        s_spec = pl.BlockSpec((1, 8, bn), lambda i, j, k: (i, 0, j))
        scratch = [pltpu.VMEM((bm, bn), jnp.float32)]
        dims = ("parallel", "parallel", "arbitrary")
    else:
        grid = (mb, nb)
        a_spec = pl.BlockSpec((bm, bk), lambda i, j: (i, 0))
        b_spec = pl.BlockSpec((bk, bn), lambda i, j: (0, j))
        v_spec = pl.BlockSpec((1, bn), lambda i, j: (0, j))
        o_spec = pl.BlockSpec((bm, bn), lambda i, j: (i, j))
        s_spec = pl.BlockSpec((1, 8, bn), lambda i, j: (i, 0, j))
        scratch = []
        dims = ("parallel", "parallel")

    in_specs = [a_spec, b_spec, v_spec]
    if has_res:
        in_specs.append(o_spec)   # residual tiled exactly like the output

    out_shape = [jax.ShapeDtypeStruct((Mp, Np), jnp.bfloat16)]
    out_specs = [o_spec]
    if with_stats:
        out_shape += [jax.ShapeDtypeStruct((mb, 8, Np), jnp.float32)] * 2
        out_specs += [s_spec, s_spec]

    return pl.pallas_call(
        _make_matmul_kernel(act, has_res, multi_k, with_stats),
        out_shape=tuple(out_shape),
        grid_spec=pltpu.PrefetchScalarGridSpec(
            num_scalar_prefetch=0,
            grid=grid,
            in_specs=in_specs,
            out_specs=tuple(out_specs),
            scratch_shapes=scratch),
        compiler_params=pltpu.CompilerParams(dimension_semantics=dims),
    )


def _pick_bm(M):
    if M <= 512:
        return M, M                      # single full-dim block, no padding
    best_bm, best_pad = None, None
    for c in BM_CANDS:
        pad = (-M) % c
        if best_pad is None or pad < best_pad:
            best_bm, best_pad = c, pad
    return best_bm, M + best_pad


def _pick_bn(N):
    if N % 256 == 0:
        return 256
    if N % 128 == 0:
        return 128
    return N                             # full-dim block for narrow outputs


def matmul_bias_act(a, b, bias, residual=None, act=None, want_stats=False):
    """out = act(a @ b + bias [+ residual]) on the MXU; optionally returns f32
    per-column mean / E[x^2] of the pre-activation (for fused BatchNorm stats)."""
    M, K = a.shape
    N = b.shape[1]
    bn = _pick_bn(N)
    nk = -(-K // BK_MAX)
    if nk == 1:
        bk, Kp = K, K
    else:
        bk = _round_up(-(-K // nk), 128)
        Kp = bk * nk
    bm, Mp = _pick_bm(M)

    a_p = a.astype(jnp.bfloat16)
    if Mp != M or Kp != K:
        a_p = jnp.pad(a_p, ((0, Mp - M), (0, Kp - K)))
    b_p = b.astype(jnp.bfloat16)
    if Kp != K:
        b_p = jnp.pad(b_p, ((0, Kp - K), (0, 0)))
    bias_f = bias.astype(jnp.float32)
    args = [a_p, b_p, bias_f.reshape(1, N)]

    has_res = residual is not None
    if has_res:
        r_p = residual.astype(jnp.bfloat16)
        if Mp != M:
            r_p = jnp.pad(r_p, ((0, Mp - M), (0, 0)))
        args.append(r_p)

    outs = _matmul_call(Mp, Kp, N, bm, bn, bk, act, has_res, want_stats)(*args)
    o = outs[0]
    if Mp != M:
        o = o[:M]
    if not want_stats:
        return o

    # Padded rows (zero A rows, zero residual rows) contribute exactly `bias` each;
    # correct analytically so the stats match the M valid rows.
    psum, psq = outs[1], outs[2]
    colsum = jnp.sum(psum[:, 0, :], axis=0)
    colsq = jnp.sum(psq[:, 0, :], axis=0)
    pad_rows = float(Mp - M)
    mean = (colsum - pad_rows * bias_f) / float(M)
    ex2 = (colsq - pad_rows * bias_f * bias_f) / float(M)
    return o, mean, ex2


# ======================= Pallas BN(scale/shift) + LeakyReLU kernel =======================

def _bn_leaky_kernel(x_ref, s_ref, t_ref, o_ref):
    y = x_ref[...].astype(jnp.float32) * s_ref[...] + t_ref[...]
    o_ref[...] = jnp.where(y > 0, y, NEG_SLOPE * y).astype(o_ref.dtype)


@functools.lru_cache(maxsize=None)
def _bn_call(N, H, W, C, bh):
    return pl.pallas_call(
        _bn_leaky_kernel,
        out_shape=jax.ShapeDtypeStruct((N, H, W, C), jnp.bfloat16),
        grid_spec=pltpu.PrefetchScalarGridSpec(
            num_scalar_prefetch=0,
            grid=(N, H // bh),
            in_specs=[pl.BlockSpec((1, bh, W, C), lambda n, h: (n, h, 0, 0)),
                      pl.BlockSpec((1, 1, 1, C), lambda n, h: (0, 0, 0, 0)),
                      pl.BlockSpec((1, 1, 1, C), lambda n, h: (0, 0, 0, 0))],
            out_specs=pl.BlockSpec((1, bh, W, C), lambda n, h: (n, h, 0, 0))),
        compiler_params=pltpu.CompilerParams(
            dimension_semantics=("parallel", "parallel")),
    )


def _pick_bh(H, W, C):
    # largest divisor of H whose block fits ~1MB; prefer >=2 H blocks (v7x megacore)
    if H * W * C * 2 <= 256 * 1024:
        return H
    budget = 1 << 20
    divs = [d for d in range(1, H + 1) if H % d == 0]
    ok = [d for d in divs if d * W * C * 2 <= budget]
    if not ok:
        return 1
    two = [d for d in ok if H // d >= 2]
    return max(two) if two else max(ok)


def _bn_leaky_apply(y, gamma, beta, mean, ex2):
    # torch BatchNorm2d training-mode: biased batch variance.
    var = jnp.maximum(ex2 - mean * mean, 0.0)
    scale = gamma.astype(jnp.float32) * lax.rsqrt(var + BN_EPS)
    shift = beta.astype(jnp.float32) - mean * scale
    N, H, W, C = y.shape
    bh = _pick_bh(H, W, C)
    return _bn_call(N, H, W, C, bh)(y, scale.reshape(1, 1, 1, C),
                                    shift.reshape(1, 1, 1, C))


# ======================= conv lowering =======================

def _pad_hw(x, ph, pw):
    # negative padding => crop (needed by the ConvTranspose2d-equivalent conv)
    if ph > 0:
        x = jnp.pad(x, ((0, 0), (ph, ph), (0, 0), (0, 0)))
    elif ph < 0:
        x = x[:, -ph:x.shape[1] + ph, :, :]
    if pw > 0:
        x = jnp.pad(x, ((0, 0), (0, 0), (pw, pw), (0, 0)))
    elif pw < 0:
        x = x[:, :, -pw:x.shape[2] + pw, :]
    return x


def _conv2d_core(x, w, b, stride, padding, act, residual=None, want_stats=False):
    # x: NHWC ; w: (KH, KW, Cin, Cout) ; b: (Cout,)
    N, _, _, Cin = x.shape
    KH, KW, _, Cout = w.shape
    sh, sw = stride
    xp = _pad_hw(x.astype(jnp.bfloat16), padding[0], padding[1])
    Hp, Wp = xp.shape[1], xp.shape[2]
    Ho = (Hp - KH) // sh + 1
    Wo = (Wp - KW) // sw + 1
    if KH == 1 and KW == 1 and sh == 1 and sw == 1:
        a = xp.reshape(N * Ho * Wo, Cin)          # free reshape (no im2col copy)
    else:
        patches = []
        for ky in range(KH):
            for kx in range(KW):
                patches.append(xp[:, ky:ky + (Ho - 1) * sh + 1:sh,
                                  kx:kx + (Wo - 1) * sw + 1:sw, :])
        a = jnp.concatenate(patches, axis=-1).reshape(N * Ho * Wo, KH * KW * Cin)
    bmat = w.reshape(KH * KW * Cin, Cout)
    res2d = residual.reshape(N * Ho * Wo, Cout) if residual is not None else None
    out = matmul_bias_act(a, bmat, b, residual=res2d, act=act, want_stats=want_stats)
    if want_stats:
        o2, mean, ex2 = out
        return o2.reshape(N, Ho, Wo, Cout), mean, ex2
    return out.reshape(N, Ho, Wo, Cout)


# ----- block-level jitted layers (shape-keyed cache; each unique shape compiles once) -----

@functools.partial(jax.jit, static_argnames=("stride", "padding", "act"))
def conv_act_layer(x, w, b, stride=(1, 1), padding=(0, 0), act=None):
    return _conv2d_core(x, w, b, stride, padding, act)


@functools.partial(jax.jit, static_argnames=("stride", "padding"))
def conv_bn_leaky_layer(x, w, b, gamma, beta, stride=(1, 1), padding=(1, 1)):
    y, mean, ex2 = _conv2d_core(x, w, b, stride, padding, None, want_stats=True)
    return _bn_leaky_apply(y, gamma, beta, mean, ex2)


@jax.jit
def res_block_layer(p, x):
    y = _conv2d_core(x, p["c1"]["w"], p["c1"]["b"], (1, 1), (0, 0), "leaky")
    y = _conv2d_core(y, p["c2"]["w"], p["c2"]["b"], (1, 1), (1, 1), "leaky")
    y, mean, ex2 = _conv2d_core(y, p["c3"]["w"], p["c3"]["b"], (1, 1), (0, 0), None,
                                residual=x, want_stats=True)
    return _bn_leaky_apply(y, p["bn"]["gamma"], p["bn"]["beta"], mean, ex2)


@functools.partial(jax.jit, static_argnames=("padding",))
def deconv_leaky_layer(x, w, b, padding=(0, 0)):
    # torch ConvTranspose2d(k=3,s=2,p) == zero-dilate input by 2, then a stride-1 conv
    # with padding k-1-p (negative => crop). `w` is stored directly in the
    # equivalent-conv HWIO layout (deterministic synthetic init, not a checkpoint).
    KH, KW = w.shape[0], w.shape[1]
    xd = lax.pad(x, jnp.zeros((), x.dtype),
                 ((0, 0, 0), (0, 0, 1), (0, 0, 1), (0, 0, 0)))
    return _conv2d_core(xd, w, b, (1, 1),
                        (KH - 1 - padding[0], KW - 1 - padding[1]), "leaky")


# ======================= parameter construction =======================

class PInit:
    def __init__(self, key):
        self._key = key

    def _next(self):
        self._key, sub = jax.random.split(self._key)
        return sub

    def conv(self, kh, kw, cin, cout):
        w = jax.random.normal(self._next(), (kh, kw, cin, cout), jnp.float32)
        w = w / jnp.sqrt(float(kh * kw * cin))
        b = 0.01 * jax.random.normal(self._next(), (cout,), jnp.float32)
        return {"w": w, "b": b}

    def bn(self, c):
        return {"gamma": jnp.ones((c,), jnp.float32),
                "beta": jnp.zeros((c,), jnp.float32)}


def init_conv_bn(pi, cin, cout):
    return {"conv": pi.conv(3, 3, cin, cout), "bn": pi.bn(cout)}


def init_res_block(pi, c):
    return {"c1": pi.conv(1, 1, c, c // 4),
            "c2": pi.conv(3, 3, c // 4, c // 16),
            "c3": pi.conv(1, 1, c // 16, c),
            "bn": pi.bn(c)}


def init_build_res(pi, c):
    return [init_res_block(pi, c) for _ in range(4)]


def init_encoder(pi, cin):
    cn = 32
    return {"C1": init_conv_bn(pi, cin, cn), "C2": init_conv_bn(pi, cn, cn),
            "conv1": pi.conv(3, 3, cn, 2 * cn),
            "C3": init_conv_bn(pi, 2 * cn, 2 * cn), "C4": init_conv_bn(pi, 2 * cn, 2 * cn),
            "conv2": pi.conv(3, 3, 2 * cn, 4 * cn),
            "C5": init_conv_bn(pi, 4 * cn, 4 * cn), "C6": init_conv_bn(pi, 4 * cn, 4 * cn),
            "conv3": pi.conv(3, 3, 4 * cn, 8 * cn),
            "C7": init_conv_bn(pi, 8 * cn, 8 * cn), "C8": init_conv_bn(pi, 8 * cn, 8 * cn)}


def init_decoder(pi, cin):
    cn = 32
    return {"c1": init_conv_bn(pi, cin, 8 * cn),
            "vonc0": pi.conv(1, 1, 16 * cn, 8 * cn),
            "c2": init_conv_bn(pi, 8 * cn, 8 * cn),
            "deconv1": pi.conv(3, 3, 8 * cn, 4 * cn),
            "c3": init_conv_bn(pi, 4 * cn, 4 * cn),
            "vonc1": pi.conv(1, 1, 8 * cn, 4 * cn),
            "c4": init_conv_bn(pi, 4 * cn, 4 * cn),
            "deconv2": pi.conv(3, 3, 4 * cn, 2 * cn),
            "c5": init_conv_bn(pi, 2 * cn, 2 * cn),
            "vonc2": pi.conv(1, 1, 4 * cn, 2 * cn),
            "c6": init_conv_bn(pi, 2 * cn, 2 * cn),
            "deconv3": pi.conv(3, 3, 2 * cn, cn),
            "c7": init_conv_bn(pi, cn, cn),
            "c8": init_conv_bn(pi, cn, cn)}


def init_generator(pi, in_channels):
    cn = 32
    text = {"enc1": init_encoder(pi, in_channels), "res1": init_build_res(pi, 8 * cn),
            "enc2": init_encoder(pi, in_channels), "res2": init_build_res(pi, 8 * cn),
            "dec1": init_decoder(pi, 16 * cn), "conv1": pi.conv(3, 3, cn, 1),
            "dec2": init_decoder(pi, 16 * cn),
            "cb1": init_conv_bn(pi, 2 * cn, 2 * cn), "conv2": pi.conv(3, 3, 2 * cn, 3)}
    inpaint = {"enc1": init_encoder(pi, in_channels), "res1": init_build_res(pi, 8 * cn),
               "dec1": init_decoder(pi, 8 * cn), "conv1": pi.conv(3, 3, cn, 3)}
    fus = {"enc1": init_encoder(pi, in_channels), "res1": init_build_res(pi, 8 * cn),
           "dec1": init_decoder(pi, 8 * cn), "conv1": pi.conv(3, 3, cn, 3)}
    return {"text": text, "inpaint": inpaint, "fus": fus}


# ======================= forward passes (python orchestration) =======================

def conv_bn_block(p, x):
    return conv_bn_leaky_layer(x, p["conv"]["w"], p["conv"]["b"],
                               p["bn"]["gamma"], p["bn"]["beta"],
                               stride=(1, 1), padding=(1, 1))


def res_net_fwd(p, x):
    for blk in p:
        x = res_block_layer(blk, x)
    return x


def encoder_fwd(p, x, get_feature_map=False):
    x = conv_bn_block(p["C1"], x)
    x = conv_bn_block(p["C2"], x)
    x = conv_act_layer(x, p["conv1"]["w"], p["conv1"]["b"],
                       stride=(2, 2), padding=ENC_PAD, act="leaky")
    x = conv_bn_block(p["C3"], x)
    x = conv_bn_block(p["C4"], x)
    f1 = x
    x = conv_act_layer(x, p["conv2"]["w"], p["conv2"]["b"],
                       stride=(2, 2), padding=ENC_PAD, act="leaky")
    x = conv_bn_block(p["C5"], x)
    x = conv_bn_block(p["C6"], x)
    f2 = x
    x = conv_act_layer(x, p["conv3"]["w"], p["conv3"]["b"],
                       stride=(2, 2), padding=ENC_PAD, act="leaky")
    x = conv_bn_block(p["C7"], x)
    x = conv_bn_block(p["C8"], x)
    if get_feature_map:
        return x, [f2, f1]
    return x


def decoder_fwd(p, x, fuse=None, get_feature_map=False):
    if fuse and fuse[0] is not None:
        x = jnp.concatenate([x, fuse[0]], axis=-1)
        x = conv_act_layer(x, p["vonc0"]["w"], p["vonc0"]["b"],
                           stride=(1, 1), padding=(0, 0), act=None)
    x = conv_bn_block(p["c1"], x)
    x = conv_bn_block(p["c2"], x)
    f1 = x
    x = deconv_leaky_layer(x, p["deconv1"]["w"], p["deconv1"]["b"], padding=DEC_PAD)
    if fuse and fuse[1] is not None:
        x = jnp.concatenate([x, fuse[1]], axis=-1)
        x = conv_act_layer(x, p["vonc1"]["w"], p["vonc1"]["b"],
                           stride=(1, 1), padding=(0, 0), act=None)
    x = conv_bn_block(p["c3"], x)
    x = conv_bn_block(p["c4"], x)
    f2 = x
    x = deconv_leaky_layer(x, p["deconv2"]["w"], p["deconv2"]["b"], padding=DEC_PAD)
    if fuse and fuse[2] is not None:
        x = jnp.concatenate([x, fuse[2]], axis=-1)
        x = conv_act_layer(x, p["vonc2"]["w"], p["vonc2"]["b"],
                           stride=(1, 1), padding=(0, 0), act=None)
    x = conv_bn_block(p["c5"], x)
    x = conv_bn_block(p["c6"], x)
    f3 = x
    x = deconv_leaky_layer(x, p["deconv3"]["w"], p["deconv3"]["b"], padding=DEC_PAD)
    x = conv_bn_block(p["c7"], x)
    x = conv_bn_block(p["c8"], x)
    if get_feature_map:
        return x, [f1, f2, f3]
    return x


def text_conv_fwd(p, x_t, x_s):
    x_t = encoder_fwd(p["enc1"], x_t)
    x_t = res_net_fwd(p["res1"], x_t)
    x_s = encoder_fwd(p["enc2"], x_s)
    x_s = res_net_fwd(p["res2"], x_s)
    x = jnp.concatenate([x_t, x_s], axis=-1)
    y_sk = decoder_fwd(p["dec1"], x, fuse=None)
    y_sk_out = conv_act_layer(y_sk, p["conv1"]["w"], p["conv1"]["b"],
                              stride=(1, 1), padding=(1, 1), act="sigmoid")
    y_t = decoder_fwd(p["dec2"], x, fuse=None)
    y_t = jnp.concatenate([y_sk, y_t], axis=-1)
    y_t = conv_bn_block(p["cb1"], y_t)
    y_t_out = conv_act_layer(y_t, p["conv2"]["w"], p["conv2"]["b"],
                             stride=(1, 1), padding=(1, 1), act="tanh")
    return y_sk_out, y_t_out


def inpaint_fwd(p, x):
    x, f_enc = encoder_fwd(p["enc1"], x, get_feature_map=True)
    x = res_net_fwd(p["res1"], x)
    x, fs = decoder_fwd(p["dec1"], x, fuse=[None] + f_enc, get_feature_map=True)
    x = conv_act_layer(x, p["conv1"]["w"], p["conv1"]["b"],
                       stride=(1, 1), padding=(1, 1), act="tanh")
    return x, fs


def fusion_fwd(p, x, fuse):
    x = encoder_fwd(p["enc1"], x)
    x = res_net_fwd(p["res1"], x)
    x = decoder_fwd(p["dec1"], x, fuse=fuse)
    x = conv_act_layer(x, p["conv1"]["w"], p["conv1"]["b"],
                       stride=(1, 1), padding=(1, 1), act="tanh")
    return x


def generator_forward(params, i_t, i_s):
    # inputs are NCHW (torch convention); compute in NHWC (bf16); return NCHW f32.
    i_t = jnp.transpose(i_t, (0, 2, 3, 1))
    i_s = jnp.transpose(i_s, (0, 2, 3, 1))
    o_sk, o_t = text_conv_fwd(params["text"], i_t, i_s)
    o_b, fuse = inpaint_fwd(params["inpaint"], i_s)
    o_f = fusion_fwd(params["fus"], o_t, fuse)
    to_nchw = lambda t: jnp.transpose(t, (0, 3, 1, 2)).astype(jnp.float32)
    return to_nchw(o_sk), to_nchw(o_t), to_nchw(o_b), to_nchw(o_f)


# ======================= main =======================

if __name__ == "__main__":
    key = jax.random.PRNGKey(0)
    kp, k1, k2 = jax.random.split(key, 3)
    in_channels = 3
    batch, H, W = 1, 8, 8   # smallest input compatible with the model's fixed
                            # calc_padding(64,128,3,2)=(32,64) paddings + skip-concats
    params = init_generator(PInit(kp), in_channels)
    i_t = jax.random.normal(k1, (batch, in_channels, H, W), jnp.float32)
    i_s = jax.random.normal(k2, (batch, in_channels, H, W), jnp.float32)

    o_sk, o_t, o_b, o_f = generator_forward(params, i_t, i_s)
    jax.block_until_ready((o_sk, o_t, o_b, o_f))

    assert o_sk.shape[0] == batch and o_sk.shape[1] == 1
    assert o_t.shape[1] == 3 and o_b.shape[1] == 3 and o_f.shape[1] == 3
    assert o_t.shape == o_f.shape
    assert bool(jnp.isfinite(o_f).all()) and bool(jnp.isfinite(o_sk).all())
    print("KERNEL_OK")
</pallas_src>

<mosaic_0001>
module attributes {stable_mosaic.version = 11 : i64} {
  func.func @kernel(%arg0: i32, %arg1: i32, %arg2: memref<64x27xbf16, #tpu.memory_space<vmem>>, %arg3: memref<27x32xbf16, #tpu.memory_space<vmem>>, %arg4: memref<1x32xf32, #tpu.memory_space<vmem>>, %arg5: memref<64x32xbf16, #tpu.memory_space<vmem>>, %arg6: memref<1x8x32xf32, #tpu.memory_space<vmem>>, %arg7: memref<1x8x32xf32, #tpu.memory_space<vmem>>) attributes {dimension_semantics = [#tpu.dimension_semantics<parallel>, #tpu.dimension_semantics<parallel>], iteration_bounds = array<i64: 1, 1>, scalar_prefetch = 0 : i64, scratch_operands = 0 : i64, tpu.core_type = #tpu.core_type<tc>, window_params = [{transform_indices = @transform_0, window_bounds = array<i64: 64, 27>}, {transform_indices = @transform_1, window_bounds = array<i64: 27, 32>}, {transform_indices = @transform_2, window_bounds = array<i64: 1, 32>}, {transform_indices = @transform_3, window_bounds = array<i64: 64, 32>}, {transform_indices = @transform_4, window_bounds = array<i64: 1, 8, 32>}, {transform_indices = @transform_5, window_bounds = array<i64: 1, 8, 32>}]} {
    %c0 = arith.constant 0 : index
    %c0_0 = arith.constant 0 : index
    %0 = vector.load %arg2[%c0, %c0_0] : memref<64x27xbf16, #tpu.memory_space<vmem>>, vector<64x27xbf16>
    %c0_1 = arith.constant 0 : index
    %c0_2 = arith.constant 0 : index
    %1 = vector.load %arg3[%c0_1, %c0_2] : memref<27x32xbf16, #tpu.memory_space<vmem>>, vector<27x32xbf16>
    %cst = arith.constant dense<0.000000e+00> : vector<64x32xf32>
    %2 = tpu.matmul %0, %1, %cst {dimension_numbers = #tpu.dot_dimension_numbers<[1], [0], [0], [1], [0, 0, 1, 1], [], []>} : vector<64x27xbf16>, vector<27x32xbf16>, vector<64x32xf32> -> vector<64x32xf32>
    %c0_3 = arith.constant 0 : index
    %c0_4 = arith.constant 0 : index
    %3 = vector.load %arg4[%c0_3, %c0_4] : memref<1x32xf32, #tpu.memory_space<vmem>>, vector<1x32xf32>
    %4 = vector.broadcast %3 : vector<1x32xf32> to vector<64x32xf32>
    %5 = arith.addf %2, %4 : vector<64x32xf32>
    %cst_5 = arith.constant dense<0.000000e+00> : vector<32xf32>
    %6 = vector.multi_reduction <add>, %5, %cst_5 [0] : vector<64x32xf32> to vector<32xf32>
    %7 = arith.mulf %5, %5 : vector<64x32xf32>
    %cst_6 = arith.constant dense<0.000000e+00> : vector<32xf32>
    %8 = vector.multi_reduction <add>, %7, %cst_6 [0] : vector<64x32xf32> to vector<32xf32>
    %9 = vector.shape_cast %6 : vector<32xf32> to vector<1x1x32xf32>
    %10 = vector.broadcast %9 : vector<1x1x32xf32> to vector<1x8x32xf32>
    %c0_7 = arith.constant 0 : index
    %c0_8 = arith.constant 0 : index
    %c0_9 = arith.constant 0 : index
    %11 = vector.load %arg6[%c0_7, %c0_8, %c0_9] : memref<1x8x32xf32, #tpu.memory_space<vmem>>, vector<1x8x32xf32>
    tpu.vector_store %arg6[%c0_7, %c0_8, %c0_9], %10 {strides = array<i32>} : memref<1x8x32xf32, #tpu.memory_space<vmem>>, vector<1x8x32xf32>,
    %12 = vector.shape_cast %8 : vector<32xf32> to vector<1x1x32xf32>
    %13 = vector.broadcast %12 : vector<1x1x32xf32> to vector<1x8x32xf32>
    %c0_10 = arith.constant 0 : index
    %c0_11 = arith.constant 0 : index
    %c0_12 = arith.constant 0 : index
    %14 = vector.load %arg7[%c0_10, %c0_11, %c0_12] : memref<1x8x32xf32, #tpu.memory_space<vmem>>, vector<1x8x32xf32>
    tpu.vector_store %arg7[%c0_10, %c0_11, %c0_12], %13 {strides = array<i32>} : memref<1x8x32xf32, #tpu.memory_space<vmem>>, vector<1x8x32xf32>,
    %15 = arith.truncf %5 : vector<64x32xf32> to vector<64x32xbf16>
    %c0_13 = arith.constant 0 : index
    %c0_14 = arith.constant 0 : index
    %16 = vector.load %arg5[%c0_13, %c0_14] : memref<64x32xbf16, #tpu.memory_space<vmem>>, vector<64x32xbf16>
    tpu.vector_store %arg5[%c0_13, %c0_14], %15 {strides = array<i32>} : memref<64x32xbf16, #tpu.memory_space<vmem>>, vector<64x32xbf16>,
    return
  }
  func.func @transform_0(%arg0: i32, %arg1: i32) -> (i32, i32) {
    %c0_i32 = arith.constant 0 : i32
    %c0_i32_0 = arith.constant 0 : i32
    return %arg0, %c0_i32 : i32, i32
  }
  func.func @transform_1(%arg0: i32, %arg1: i32) -> (i32, i32) {
    %c0_i32 = arith.constant 0 : i32
    %c0_i32_0 = arith.constant 0 : i32
    return %c0_i32, %arg1 : i32, i32
  }
  func.func @transform_2(%arg0: i32, %arg1: i32) -> (i32, i32) {
    %c0_i32 = arith.constant 0 : i32
    %c0_i32_0 = arith.constant 0 : i32
    return %c0_i32, %arg1 : i32, i32
  }
  func.func @transform_3(%arg0: i32, %arg1: i32) -> (i32, i32) {
    %c0_i32 = arith.constant 0 : i32
    return %arg0, %arg1 : i32, i32
  }
  func.func @transform_4(%arg0: i32, %arg1: i32) -> (i32, i32, i32) {
    %c0_i32 = arith.constant 0 : i32
    %c0_i32_0 = arith.constant 0 : i32
    return %arg0, %c0_i32, %arg1 : i32, i32, i32
  }
  func.func @transform_5(%arg0: i32, %arg1: i32) -> (i32, i32, i32) {
    %c0_i32 = arith.constant 0 : i32
    %c0_i32_0 = arith.constant 0 : i32
    return %arg0, %c0_i32, %arg1 : i32, i32, i32
  }
}

module attributes {stable_mosaic.version = 11 : i64} {
  func.func @_bn_leaky_kernel(%arg0: i32, %arg1: i32, %arg2: memref<1x8x8x32xbf16, #tpu.memory_space<vmem>>, %arg3: memref<1x1x1x32xf32, #tpu.memory_space<vmem>>, %arg4: memref<1x1x1x32xf32, #tpu.memory_space<vmem>>, %arg5: memref<1x8x8x32xbf16, #tpu.memory_space<vmem>>) attributes {dimension_semantics = [#tpu.dimension_semantics<parallel>, #tpu.dimension_semantics<parallel>], iteration_bounds = array<i64: 1, 1>, scalar_prefetch = 0 : i64, scratch_operands = 0 : i64, tpu.core_type = #tpu.core_type<tc>, window_params = [{transform_indices = @transform_0, window_bounds = array<i64: 1, 8, 8, 32>}, {pipeline_mode = #tpu.pipeline_mode<synchronous>, transform_indices = @transform_1, window_bounds = array<i64: 1, 1, 1, 32>}, {pipeline_mode = #tpu.pipeline_mode<synchronous>, transform_indices = @transform_2, window_bounds = array<i64: 1, 1, 1, 32>}, {transform_indices = @transform_3, window_bounds = array<i64: 1, 8, 8, 32>}]} {
    %c0 = arith.constant 0 : index
    %c0_0 = arith.constant 0 : index
    %c0_1 = arith.constant 0 : index
    %c0_2 = arith.constant 0 : index
    %0 = vector.load %arg2[%c0, %c0_0, %c0_1, %c0_2] : memref<1x8x8x32xbf16, #tpu.memory_space<vmem>>, vector<1x8x8x32xbf16>
    %1 = arith.extf %0 : vector<1x8x8x32xbf16> to vector<1x8x8x32xf32>
    %c0_3 = arith.constant 0 : index
    %c0_4 = arith.constant 0 : index
    %c0_5 = arith.constant 0 : index
    %c0_6 = arith.constant 0 : index
    %2 = vector.load %arg3[%c0_3, %c0_4, %c0_5, %c0_6] : memref<1x1x1x32xf32, #tpu.memory_space<vmem>>, vector<1x1x1x32xf32>
    %3 = vector.broadcast %2 : vector<1x1x1x32xf32> to vector<1x8x8x32xf32>
    %4 = arith.mulf %1, %3 : vector<1x8x8x32xf32>
    %c0_7 = arith.constant 0 : index
    %c0_8 = arith.constant 0 : index
    %c0_9 = arith.constant 0 : index
    %c0_10 = arith.constant 0 : index
    %5 = vector.load %arg4[%c0_7, %c0_8, %c0_9, %c0_10] : memref<1x1x1x32xf32, #tpu.memory_space<vmem>>, vector<1x1x1x32xf32>
    %6 = vector.broadcast %5 : vector<1x1x1x32xf32> to vector<1x8x8x32xf32>
    %7 = arith.addf %4, %6 : vector<1x8x8x32xf32>
    %cst = arith.constant 0.000000e+00 : f32
    %8 = vector.broadcast %cst : f32 to vector<1x8x8x32xf32>
    %9 = arith.cmpf ogt, %7, %8 : vector<1x8x8x32xf32>
    %cst_11 = arith.constant 0.00999999977 : f32
    %10 = vector.broadcast %cst_11 : f32 to vector<1x8x8x32xf32>
    %11 = arith.mulf %10, %7 : vector<1x8x8x32xf32>
    %12 = arith.select %9, %7, %11 : vector<1x8x8x32xi1>, vector<1x8x8x32xf32>
    %13 = arith.truncf %12 : vector<1x8x8x32xf32> to vector<1x8x8x32xbf16>
    %c0_12 = arith.constant 0 : index
    %c0_13 = arith.constant 0 : index
    %c0_14 = arith.constant 0 : index
    %c0_15 = arith.constant 0 : index
    %14 = vector.load %arg5[%c0_12, %c0_13, %c0_14, %c0_15] : memref<1x8x8x32xbf16, #tpu.memory_space<vmem>>, vector<1x8x8x32xbf16>
    tpu.vector_store %arg5[%c0_12, %c0_13, %c0_14, %c0_15], %13 {strides = array<i32>} : memref<1x8x8x32xbf16, #tpu.memory_space<vmem>>, vector<1x8x8x32xbf16>,
    return
  }
  func.func @transform_0(%arg0: i32, %arg1: i32) -> (i32, i32, i32, i32) {
    %c0_i32 = arith.constant 0 : i32
    %c0_i32_0 = arith.constant 0 : i32
    %c0_i32_1 = arith.constant 0 : i32
    return %arg0, %arg1, %c0_i32, %c0_i32_0 : i32, i32, i32, i32
  }
  func.func @transform_1(%arg0: i32, %arg1: i32) -> (i32, i32, i32, i32) {
    %c0_i32 = arith.constant 0 : i32
    %c0_i32_0 = arith.constant 0 : i32
    %c0_i32_1 = arith.constant 0 : i32
    %c0_i32_2 = arith.constant 0 : i32
    %c0_i32_3 = arith.constant 0 : i32
    return %c0_i32, %c0_i32_0, %c0_i32_1, %c0_i32_2 : i32, i32, i32, i32
  }
  func.func @transform_2(%arg0: i32, %arg1: i32) -> (i32, i32, i32, i32) {
    %c0_i32 = arith.constant 0 : i32
    %c0_i32_0 = arith.constant 0 : i32
    %c0_i32_1 = arith.constant 0 : i32
    %c0_i32_2 = arith.constant 0 : i32
    %c0_i32_3 = arith.constant 0 : i32
    return %c0_i32, %c0_i32_0, %c0_i32_1, %c0_i32_2 : i32, i32, i32, i32
  }
  func.func @transform_3(%arg0: i32, %arg1: i32) -> (i32, i32, i32, i32) {
    %c0_i32 = arith.constant 0 : i32
    %c0_i32_0 = arith.constant 0 : i32
    %c0_i32_1 = arith.constant 0 : i32
    return %arg0, %arg1, %c0_i32, %c0_i32_0 : i32, i32, i32, i32
  }
}

</mosaic_0001>

<bundles_post_ra>
// kernel: conv_bn_leaky_layer.3
= control target key start
LH: loop header
LB: loop body
LE: loop exit
PB: predicated region body
PF: predicated region fallthrough
CT: control target
= control target key end

     0   :  { %vm87_vm0 = vcmask 257024   ;;  %s216_s0 = inlined_call_operand.vmem [shape: bf16[1,8,8,32], index: 0, kind: input, shape index: {}]   ;;  %s217_s1 = inlined_call_operand.vmem [shape: f32[1,1,1,32], index: 1, kind: input, shape index: {}]   ;;  %s218_s2 = inlined_call_operand.vmem [shape: f32[1,1,1,32], index: 2, kind: input, shape index: {}]   ;;  %s219_s3 = inlined_call_operand.hbm [shape: bf16[1,8,8,32], index: 3, kind: output, shape index: {}]  }
   0x1   :  { %v115_v0 = vld [vmem:[%s216_s0] sm:$0xff]   ;;  %v130_v5 = vld [vmem:[%s216_s0 + $0x8] sm:$0xff]   ;;  %v131_v8 = vld [vmem:[%s216_s0 + $0x10] sm:$0xff]  }
   0x2   :  { %v136_v1 = vld [vmem:[%s217_s1] ss:$0 sm:$0xff]  ;;  %v116_v2 = vunpack.c.l.bf16 %v115_v0  ;;  %v117_v4 = vunpack.c.h.bf16 %v115_v0  ;;  %v120_v6 = vunpack.c.l.bf16 %v130_v5  ;;  %v121_v7 = vunpack.c.h.bf16 %v130_v5  ;;  %v132_v9 = vld [vmem:[%s216_s0 + $0x18] sm:$0xff]  }
   0x3   :  { %v137_v3 = vld [vmem:[%s218_s2] ss:$0 sm:$0xff] }
   0x4   :  { %8 = vsyncpa [#allocation3], 0  ;;  %v35_v10 = vmul.f32 %v136_v1, %v116_v2  ;;  %v36_v11 = vmul.f32 %v136_v1, %v117_v4  ;;  %v124_v12 = vunpack.c.l.bf16 %v131_v8  ;;  %v125_v13 = vunpack.c.h.bf16 %v131_v8  ;;  %s164_s0 = smov [#allocation2]   ;;  %s102_s25 = sshll.u32 %s219_s3, 4  ;;  %s103_s25 = int_to_ptr.hbm [resolvable:$true] %s102_s25 }
   0x5   :  { %v37_v14 = vmul.f32 %v136_v1, %v120_v6  ;;  %v38_v15 = vmul.f32 %v136_v1, %v121_v7  ;;  %v128_v16 = vunpack.c.l.bf16 %v132_v9  ;;  %v129_v17 = vunpack.c.h.bf16 %v132_v9  ;;  %s100_s1 = sshll.u32 %s164_s0, 4  ;;  %s165_s3 = smov 64   ;;  %s101_s1 = int_to_ptr.vmem [resolvable:$true] %s100_s1 }
   0x6   :  { %v47_v18 = vadd.f32 %v137_v3, %v35_v10  ;;  %v48_v19 = vadd.f32 %v137_v3, %v36_v11  ;;  %v39_v20 = vmul.f32 %v136_v1, %v124_v12  ;;  %v40_v21 = vmul.f32 %v136_v1, %v125_v13  ;;  %s166_s26 = smov 4  }
   0x7   :  { %v49_v22 = vadd.f32 %v137_v3, %v37_v14  ;;  %v50_v23 = vadd.f32 %v137_v3, %v38_v15  ;;  %v41_v24 = vmul.f32 %v136_v1, %v128_v16  ;;  %v42_v25 = vmul.f32 %v136_v1, %v129_v17 }
   0x8   :  { %vm55_vm1 = vcmp.gt.f32.partialorder %v47_v18, 0.0  ;;  %v63_v26 = vmul.f32 0.01, %v47_v18  ;;  %vm56_vm2 = vcmp.gt.f32.partialorder %v48_v19, 0.0  ;;  %v64_v27 = vmul.f32 0.01, %v48_v19 }
   0x9   :  { %vm57_vm3 = vcmp.gt.f32.partialorder %v49_v22, 0.0  ;;  %v65_v28 = vmul.f32 0.01, %v49_v22  ;;  %vm58_vm4 = vcmp.gt.f32.partialorder %v50_v23, 0.0  ;;  %v66_v29 = vmul.f32 0.01, %v50_v23 }
   0xa   :  { %v71_v30 = vsel %vm55_vm1, %v47_v18, %v63_v26  ;;  %v72_v31 = vsel %vm56_vm2, %v48_v19, %v64_v27  ;;  %v51_v32 = vadd.f32 %v137_v3, %v39_v20  ;;  %v52_v33 = vadd.f32 %v137_v3, %v40_v21 }
   0xb   :  { %v79_v34 = vpack.c.bf16 %v71_v30, %v71_v30  ;;  %v80_v35 = vpack.c.bf16 %v72_v31, %v72_v31  ;;  %v73_v36 = vsel %vm57_vm3, %v49_v22, %v65_v28  ;;  %v74_v37 = vsel %vm58_vm4, %v50_v23, %v66_v29 }
   0xc   :  { %v81_v38 = vpack.c.bf16 %v73_v36, %v73_v36  ;;  %v82_v39 = vpack.c.bf16 %v74_v37, %v74_v37  ;;  %vm59_vm5 = vcmp.gt.f32.partialorder %v51_v32, 0.0  ;;  %v67_v40 = vmul.f32 0.01, %v51_v32 }
   0xd   :  { %88 = vst.msk [vmem:[#allocation2] sm:$0xf] %vm87_vm0, %v79_v34  ;;  %vm60_vm6 = vcmp.gt.f32.partialorder %v52_v33, 0.0  ;;  %v68_v41 = vmul.f32 0.01, %v52_v33  ;;  %v53_v42 = vadd.f32 %v137_v3, %v41_v24  ;;  %v54_v43 = vadd.f32 %v137_v3, %v42_v25 }
   0xe   :  { %89 = vst.msk [vmem:[#allocation2 + $0x4] sm:$0xf] %vm87_vm0, %v80_v35  ;;  %v75_v44 = vsel %vm59_vm5, %v51_v32, %v67_v40 }
   0xf   :  { %90 = vst.msk [vmem:[#allocation2 + $0x8] sm:$0xf] %vm87_vm0, %v81_v38  ;;  %v83_v45 = vpack.c.bf16 %v75_v44, %v75_v44  ;;  %v76_v46 = vsel %vm60_vm6, %v52_v33, %v68_v41  ;;  %vm61_vm7 = vcmp.gt.f32.partialorder %v53_v42, 0.0  ;;  %v69_v47 = vmul.f32 0.01, %v53_v42 }
  0x10   :  { %91 = vst.msk [vmem:[#allocation2 + $0xc] sm:$0xf] %vm87_vm0, %v82_v39  ;;  %v84_v48 = vpack.c.bf16 %v76_v46, %v76_v46  ;;  %vm62_vm8 = vcmp.gt.f32.partialorder %v54_v43, 0.0  ;;  %v70_v49 = vmul.f32 0.01, %v54_v43 }
  0x11   :  { %92 = vst.msk [vmem:[#allocation2 + $0x10] sm:$0xf] %vm87_vm0, %v83_v45  ;;  %v77_v50 = vsel %vm61_vm7, %v53_v42, %v69_v47 }
  0x12   :  { %93 = vst.msk [vmem:[#allocation2 + $0x14] sm:$0xf] %vm87_vm0, %v84_v48  ;;  %v85_v51 = vpack.c.bf16 %v77_v50, %v77_v50  ;;  %v78_v52 = vsel %vm62_vm8, %v54_v43, %v70_v49 }
  0x13   :  { %v86_v53 = vpack.c.bf16 %v78_v52, %v78_v52 }
  0x14   :  { %94 = vst.msk [vmem:[#allocation2 + $0x18] sm:$0xf] %vm87_vm0, %v85_v51 }
  0x15   :  { %95 = vst.msk [vmem:[#allocation2 + $0x1c] sm:$0xf] %vm87_vm0, %v86_v53 }
  0x16   :  { %108 = dma.vmem_to_hbm [thread:$0]  %s101_s1, 512, %s103_s25, [#allocation3], %s165_s3, %s165_s3, %s166_s26  }
  0x17   :  { %162 = dma.done.wait [#allocation3], 512  }
  0x18   :  { %163 = vsyncadd [#allocation3], 4294966784 }
  0x19   :  { %113 = vsyncpa [#allocation3], 1 }

// kernel: conv_bn_leaky_layer.2
= control target key start
LH: loop header
LB: loop body
LE: loop exit
PB: predicated region body
PF: predicated region fallthrough
CT: control target
= control target key end

     0   :  { %vm78_vm0 = vcmask 1044480   ;;  %vm79_vm1 = vcmask 1045504   ;;  %v238_v2 = vmov 65535   ;;  %vm65_vm2 = vcmask 220160   ;;  %s349_s1 = inlined_call_operand.vmem [shape: bf16[27,32], index: 1, kind: input, shape index: {}]   ;;  %s350_s2 = inlined_call_operand.vmem [shape: f32[1,32], index: 2, kind: input, shape index: {}]   ;;  %s351_s0 = inlined_call_operand.vmem [shape: bf16[64,27], index: 0, kind: input, shape index: {}]   ;;  %s352_s3 = inlined_call_operand.vmem [shape: bf16[64,32], index: 3, kind: output, shape index: {0}]   ;;  %s353_s4 = inlined_call_operand.vmem [shape: f32[1,8,32], index: 4, kind: output, shape index: {1}]   ;;  %s354_s5 = inlined_call_operand.vmem [shape: f32[1,8,32], index: 5, kind: output, shape index: {2}]  }
   0x1   :  { %v218_v0 = vld [vmem:[%s349_s1 + $0x8] sm:$0xf]  ;;  %v229_v1 = vld [vmem:[%s349_s1 + $0x8] sm:$0x30]  ;;  %v80_v3 = vsel %vm78_vm0, 4294967295, %v238_v2  ;;  %v228_v7 = vld [vmem:[%s349_s1] sm:$0xff] }
   0x2   :  { %v219_v4 = vor.u32 %v229_v1, %v218_v0  ;;  %v81_v5 = vsel %vm79_vm1, %v80_v3, 0  ;;  %v224_v8 = vld [vmem:[%s351_s0] sm:$0xff]  ;;  %v225_v9 = vld [vmem:[%s351_s0 + $0x8] sm:$0xff]  ;;  %v226_v10 = vld [vmem:[%s351_s0 + $0x10] sm:$0xff]  ;;  %vm175_vm3 = vcmask 257024   ;;  %vm114_vm4 = vcmask 261120  }
   0x3   :  { %v227_v11 = vld [vmem:[%s351_s0 + $0x18] sm:$0xff]  ;;  %v237_v12 = vld [vmem:[%s350_s2] ss:$0 sm:$0xff] }
   0x4   :  { %v83_v6 = vand.u32 %v219_v4, %v81_v5 }
   0x6   :  { %91 = vmatpush.bf16.msra.mxu0 %v83_v6  ;;  %230 = vmatpush.bf16.msra.mxu1 %v83_v6 }
   0x7   :  { %231 = vmatpush.bf16.msra.mxu2 %v83_v6  ;;  %232 = vmatpush.bf16.msra.mxu3 %v83_v6 }
   0xa   :  { %92 = vmatpush.bf16.msra.mxu0 %v228_v7  ;;  %233 = vmatpush.bf16.msra.mxu1 %v228_v7 }
   0xb   :  { %234 = vmatpush.bf16.msra.mxu2 %v228_v7  ;;  %235 = vmatpush.bf16.msra.mxu3 %v228_v7 }
   0xd   :  { %220 = vmatmul.msk.bf16.vlgmr.msra.gmra.mxu0 %vm65_vm2, %v224_v8  ;;  %221 = vmatmul.msk.bf16.vlgmr.msra.gmra.mxu1 %vm65_vm2, %v225_v9 }
   0xe   :  { %222 = vmatmul.msk.bf16.vlgmr.msra.gmra.mxu2 %vm65_vm2, %v226_v10  ;;  %223 = vmatmul.msk.bf16.vlgmr.msra.gmra.mxu3 %vm65_vm2, %v227_v11 }
  0x8a   :  { %v94_v13 = vpop.f32.mrf.mxu0  ;;  %v99_v14 = vpop.f32.mrf.mxu1 }
  0x8b   :  { %v95_v15 = vadd.f32 %v237_v12, %v94_v13  ;;  %v100_v16 = vadd.f32 %v237_v12, %v99_v14 }
  0x8d   :  { %v167_v17 = vpack.c.bf16 %v95_v15, %v95_v15  ;;  %v169_v18 = vpack.c.bf16 %v100_v16, %v100_v16  ;;  %v136_v25 = vmul.f32 %v95_v15, %v95_v15  ;;  %v115_v28 = vsel %vm114_vm4, %v95_v15, 0.0 }
  0x8e   :  { %v138_v30 = vmul.f32 %v100_v16, %v100_v16  ;;  %v118_v34 = vsel %vm114_vm4, %v100_v16, 0.0 }
  0x8f   :  { %176 = vst.msk [vmem:[%s352_s3] sm:$0xf] %vm175_vm3, %v167_v17  ;;  %v144_v37 = vsel %vm114_vm4, %v136_v25, 0.0 }
  0x90   :  { %178 = vst.msk [vmem:[%s352_s3 + $0x8] sm:$0xf] %vm175_vm3, %v169_v18  ;;  %v147_v43 = vsel %vm114_vm4, %v138_v30, 0.0 }
  0x91   :  { %v104_v19 = vpop.f32.mrf.mxu2  ;;  %v109_v20 = vpop.f32.mrf.mxu3 }
  0x92   :  { %v105_v21 = vadd.f32 %v237_v12, %v104_v19  ;;  %v110_v22 = vadd.f32 %v237_v12, %v109_v20  ;;  %v96_v23 = vpop.f32.mrf.mxu0  ;;  %v101_v24 = vpop.f32.mrf.mxu1 }
  0x93   :  { %v97_v26 = vadd.f32 %v237_v12, %v96_v23  ;;  %v102_v27 = vadd.f32 %v237_v12, %v101_v24 }
  0x94   :  { %v171_v29 = vpack.c.bf16 %v105_v21, %v105_v21  ;;  %v173_v31 = vpack.c.bf16 %v110_v22, %v110_v22  ;;  %v140_v44 = vmul.f32 %v105_v21, %v105_v21  ;;  %v122_v52 = vsel %vm114_vm4, %v105_v21, 0.0 }
  0x95   :  { %v116_v32 = vsel %vm114_vm4, %v97_v26, 0.0  ;;  %v137_v33 = vmul.f32 %v97_v26, %v97_v26  ;;  %v168_v36 = vpack.c.bf16 %v97_v26, %v97_v26  ;;  %v139_v39 = vmul.f32 %v102_v27, %v102_v27 }
  0x96   :  { %180 = vst.msk [vmem:[%s352_s3 + $0x10] sm:$0xf] %vm175_vm3, %v171_v29  ;;  %v117_v35 = vadd.f32 %v116_v32, %v115_v28  ;;  %v170_v40 = vpack.c.bf16 %v102_v27, %v102_v27  ;;  %v120_v45 = vsel %vm114_vm4, %v102_v27, 0.0  ;;  %v142_v54 = vmul.f32 %v110_v22, %v110_v22 }
  0x97   :  { %182 = vst.msk [vmem:[%s352_s3 + $0x18] sm:$0xf] %vm175_vm3, %v173_v31  ;;  %v145_v38 = vsel %vm114_vm4, %v137_v33, 0.0  ;;  %v149_v53 = vsel %vm114_vm4, %v139_v39, 0.0  ;;  %v151_v58 = vsel %vm114_vm4, %v140_v44, 0.0  ;;  %v126_v0 = vsel %vm114_vm4, %v110_v22, 0.0 }
  0x98   :  { %v146_v41 = vadd.f32 %v145_v38, %v144_v37  ;;  %177 = vst.msk [vmem:[%s352_s3 + $0x4] sm:$0xf] %vm175_vm3, %v168_v36  ;;  %v119_v42 = vadd.f32 %v118_v34, %v117_v35  ;;  %v155_v5 = vsel %vm114_vm4, %v142_v54, 0.0 }
  0x99   :  { %179 = vst.msk [vmem:[%s352_s3 + $0xc] sm:$0xf] %vm175_vm3, %v170_v40  ;;  %v106_v46 = vpop.f32.mrf.mxu2  ;;  %v111_v47 = vpop.f32.mrf.mxu3 }
  0x9a   :  { %v121_v48 = vadd.f32 %v120_v45, %v119_v42  ;;  %v148_v49 = vadd.f32 %v147_v43, %v146_v41  ;;  %v107_v50 = vadd.f32 %v237_v12, %v106_v46  ;;  %v112_v51 = vadd.f32 %v237_v12, %v111_v47 }
  0x9c   :  { %v150_v55 = vadd.f32 %v149_v53, %v148_v49  ;;  %v123_v56 = vadd.f32 %v122_v52, %v121_v48  ;;  %v141_v57 = vmul.f32 %v107_v50, %v107_v50  ;;  %v124_v59 = vsel %vm114_vm4, %v107_v50, 0.0 }
  0x9d   :  { %v172_v60 = vpack.c.bf16 %v107_v50, %v107_v50  ;;  %v174_v61 = vpack.c.bf16 %v112_v51, %v112_v51  ;;  %v143_v2 = vmul.f32 %v112_v51, %v112_v51  ;;  %v128_v6 = vsel %vm114_vm4, %v112_v51, 0.0 }
  0x9e   :  { %v125_v62 = vadd.f32 %v124_v59, %v123_v56  ;;  %v152_v63 = vadd.f32 %v151_v58, %v150_v55  ;;  %v153_v1 = vsel %vm114_vm4, %v141_v57, 0.0 }
  0x9f   :  { %181 = vst.msk [vmem:[%s352_s3 + $0x14] sm:$0xf] %vm175_vm3, %v172_v60  ;;  %v157_v9 = vsel %vm114_vm4, %v143_v2, 0.0 }
  0xa0   :  { %v154_v3 = vadd.f32 %v153_v1, %v152_v63  ;;  %v127_v4 = vadd.f32 %v126_v0, %v125_v62  ;;  %183 = vst.msk [vmem:[%s352_s3 + $0x1c] sm:$0xf] %vm175_vm3, %v174_v61 }
  0xa2   :  { %v129_v7 = vadd.f32 %v128_v6, %v127_v4  ;;  %v156_v8 = vadd.f32 %v155_v5, %v154_v3 }
  0xa4   :  { %v130_v10 = vrot.slane %v129_v7, 4  ;;  %v158_v11 = vadd.f32 %v157_v9, %v156_v8 }
  0xa6   :  { %v131_v12 = vadd.f32 %v130_v10, %v129_v7  ;;  %v159_v13 = vrot.slane %v158_v11, 4 }
  0xa8   :  { %v132_v14 = vrot.slane %v131_v12, 2  ;;  %v160_v15 = vadd.f32 %v159_v13, %v158_v11 }
  0xaa   :  { %v133_v16 = vadd.f32 %v132_v14, %v131_v12  ;;  %v161_v17 = vrot.slane %v160_v15, 2 }
  0xac   :  { %v134_v18 = vrot.slane %v133_v16, 1  ;;  %v162_v19 = vadd.f32 %v161_v17, %v160_v15 }
  0xae   :  { %v135_v20 = vadd.f32 %v134_v18, %v133_v16  ;;  %v163_v21 = vrot.slane %v162_v19, 1 }
  0xb0   :  { %v164_v22 = vadd.f32 %v163_v21, %v162_v19  ;;  %165 = vst.msk [vmem:[%s353_s4] sm:$0xff] %vm114_vm4, %v135_v20 }
  0xb2   :  { %166 = vst.msk [vmem:[%s354_s5] sm:$0xff] %vm114_vm4, %v164_v22 }

</bundles_post_ra>
